<compile_context>
chip_gen: v7x
topology: tpu7x:2x2x1
jax: 0.10.0
libtpu: 0.0.40
codegen_flags: <defaults>
</compile_context>

<pallas_src>
import functools

import jax
import jax.numpy as jnp
import numpy as np
from jax.experimental import pallas as pl
from jax.experimental.pallas import tpu as pltpu


def _sincos_omega(embed_dim: int) -> np.ndarray:
    """omega[d] = 1 / 10000 ** (d / (embed_dim/2)); shape (1, embed_dim//2), f32."""
    half = embed_dim // 2
    omega = np.arange(half, dtype=np.float64) / (embed_dim / 2.0)
    return (1.0 / 10000.0 ** omega).astype(np.float32)[None, :]


def _temporal_encoder_kernel(year_ref, jday_ref, omy_ref, omj_ref, scale_ref,
                             out_ref, *scratch,
                             year_dim, jday_dim, embed_dim, tokens_per_frame):
    """year/jday: (TM, 1) f32; om*: (1, half) f32; scale: (1,) f32 SMEM;
    out: (TM, tokens_per_frame * embed_dim)."""
    hy = year_dim // 2
    hj = jday_dim // 2
    scale = scale_ref[0]

    # Outer products: (TM, 1) * (1, half) -> (TM, half). Pure VPU broadcast work.
    phase_y = year_ref[...] * omy_ref[...]
    phase_j = jday_ref[...] * omj_ref[...]

    # sin/cos in f32 (EUP); scale + cast ride in spare VPU slots.
    sin_y = (scale * jnp.sin(phase_y)).astype(out_ref.dtype)
    cos_y = (scale * jnp.cos(phase_y)).astype(out_ref.dtype)
    sin_j = (scale * jnp.sin(phase_j)).astype(out_ref.dtype)
    cos_j = (scale * jnp.cos(phase_j)).astype(out_ref.dtype)

    if tokens_per_frame == 1:
        # Write segments straight into the output block (no concat temporaries).
        out_ref[:, 0:hy] = sin_y
        out_ref[:, hy:year_dim] = cos_y
        out_ref[:, year_dim:year_dim + hj] = sin_j
        out_ref[:, year_dim + hj:embed_dim] = cos_j
    else:
        # Assemble one frame's embedding in VMEM scratch, then replicate it
        # tokens_per_frame times into the output block (fused repeat_interleave).
        emb_ref, = scratch
        emb_ref[:, 0:hy] = sin_y
        emb_ref[:, hy:year_dim] = cos_y
        emb_ref[:, year_dim:year_dim + hj] = sin_j
        emb_ref[:, year_dim + hj:embed_dim] = cos_j
        emb = emb_ref[...]
        for j in range(tokens_per_frame):          # static unroll; EUP work done once
            out_ref[:, j * embed_dim:(j + 1) * embed_dim] = emb


def temporal_encoder_forward(temporal_coords, scale, embed_dim,
                             tokens_per_frame=None, out_dtype=jnp.float32):
    """JAX/Pallas equivalent of TemporalEncoder.forward.

    Args:
      temporal_coords: (B, T, 2) float array with [year, day_of_year].
      scale: (1,) float array (buffer of ones, or trainable 0.1 init).
      embed_dim: embedding dimension (must be divisible by 4).
      tokens_per_frame: optional int; if given the embedding is repeated over T
        (fused into the kernel's output layout).
      out_dtype: output dtype (use jnp.bfloat16 to halve HBM store traffic when
        the consumer runs in bf16; math stays f32).

    Returns:
      (B, T, embed_dim) or (B, T*tokens_per_frame, embed_dim) array of out_dtype.
    """
    B, T, _ = temporal_coords.shape
    M = B * T
    year_dim = embed_dim // 2
    jday_dim = embed_dim - year_dim
    assert year_dim % 2 == 0 and jday_dim % 2 == 0, "sincos embed dims must be even"
    hy, hj = year_dim // 2, jday_dim // 2

    tpf = 1 if tokens_per_frame is None else int(tokens_per_frame)
    out_width = tpf * embed_dim

    # Clean (M, 1) position columns instead of lane slices of an (M, 2) array.
    year = temporal_coords[..., 0].reshape(M, 1).astype(jnp.float32)
    jday = temporal_coords[..., 1].reshape(M, 1).astype(jnp.float32)
    scale = jnp.asarray(scale, jnp.float32).reshape((1,))

    # Trace-time omega tables (no pow/exp/log inside the kernel).
    omega_y = jnp.asarray(_sincos_omega(year_dim))
    omega_j = jnp.asarray(_sincos_omega(jday_dim))

    # Row tile: output block ~<= 4 MiB so double-buffering stays well inside the
    # default scoped VMEM budget on v5e (16 MiB) / v6e (32 MiB) / v7x (32 of 64 MiB).
    row_bytes = out_width * jnp.dtype(out_dtype).itemsize
    tm_cap = max(8, (int((4 * 1024 * 1024) // max(row_bytes, 1)) // 8) * 8)
    TM = M if M <= tm_cap else tm_cap
    grid = (pl.cdiv(M, TM),)

    kernel = functools.partial(
        _temporal_encoder_kernel,
        year_dim=year_dim, jday_dim=jday_dim,
        embed_dim=embed_dim, tokens_per_frame=tpf)

    scratch_shapes = [pltpu.VMEM((TM, embed_dim), out_dtype)] if tpf > 1 else []

    out = pl.pallas_call(
        kernel,
        out_shape=jax.ShapeDtypeStruct((M, out_width), out_dtype),
        grid=grid,
        in_specs=[
            pl.BlockSpec((TM, 1), lambda i: (i, 0)),              # year column
            pl.BlockSpec((TM, 1), lambda i: (i, 0)),              # julian-day column
            pl.BlockSpec((1, hy), lambda i: (0, 0)),              # omega_year
            pl.BlockSpec((1, hj), lambda i: (0, 0)),              # omega_jday
            pl.BlockSpec(memory_space=pltpu.MemorySpace.SMEM),    # scale scalar
        ],
        out_specs=pl.BlockSpec((TM, out_width), lambda i: (i, 0)),
        scratch_shapes=scratch_shapes,
        compiler_params=pltpu.CompilerParams(
            dimension_semantics=("parallel",),
            vmem_limit_bytes=32 * 1024 * 1024),
    )(year, jday, omega_y, omega_j, scale)

    # (M, tpf*D) -> (B, T*tpf, D) is a contiguity-preserving (copy-free) reshape;
    # this IS the repeat_interleave result, with no extra HBM pass.
    if tokens_per_frame is None:
        return out.reshape(B, T, embed_dim)
    return out.reshape(B, T * tokens_per_frame, embed_dim)


def _reference_forward(temporal_coords, scale, embed_dim, tokens_per_frame=None):
    """Pure-JAX reference mirroring the PyTorch module (shares the omega table)."""
    B, T, _ = temporal_coords.shape
    year_dim = embed_dim // 2
    jday_dim = embed_dim - year_dim

    def sincos(edim, pos):
        omega = jnp.asarray(_sincos_omega(edim))[0]
        out = jnp.einsum("m,d->md", pos.reshape(-1).astype(jnp.float32), omega)
        return jnp.concatenate([jnp.sin(out), jnp.cos(out)], axis=1)

    year = sincos(year_dim, temporal_coords[:, :, 0]).reshape(B, T, -1)
    jday = sincos(jday_dim, temporal_coords[:, :, 1]).reshape(B, T, -1)
    emb = scale * jnp.concatenate([year, jday], axis=-1)
    if tokens_per_frame is not None:
        emb = jnp.repeat(emb, tokens_per_frame, axis=1)
    return emb


if __name__ == "__main__":
    key = jax.random.PRNGKey(0)
    k_year, k_day = jax.random.split(key)

    B, T = 2, 3
    embed_dim = 32
    tokens_per_frame = 4

    years = jax.random.randint(k_year, (B, T, 1), 2015, 2023).astype(jnp.float32)
    days = jax.random.randint(k_day, (B, T, 1), 1, 366).astype(jnp.float32)
    temporal_coords = jnp.concatenate([years, days], axis=-1)   # (B, T, 2)

    # trainable_scale=False  ->  buffer of ones(1)
    scale = jnp.ones((1,), dtype=jnp.float32)

    # With fused tokens_per_frame repeat.
    out = temporal_encoder_forward(temporal_coords, scale, embed_dim, tokens_per_frame)
    out = jax.block_until_ready(out)
    ref = _reference_forward(temporal_coords, scale, embed_dim, tokens_per_frame)
    assert out.shape == (B, T * tokens_per_frame, embed_dim), out.shape
    np.testing.assert_allclose(np.asarray(out), np.asarray(ref), rtol=1e-5, atol=1e-5)

    # Without repeat (tokens_per_frame=None).
    out2 = temporal_encoder_forward(temporal_coords, scale, embed_dim, None)
    out2 = jax.block_until_ready(out2)
    ref2 = _reference_forward(temporal_coords, scale, embed_dim, None)
    assert out2.shape == (B, T, embed_dim), out2.shape
    np.testing.assert_allclose(np.asarray(out2), np.asarray(ref2), rtol=1e-5, atol=1e-5)

    print("KERNEL_OK")
</pallas_src>

<mosaic_0001>
module attributes {stable_mosaic.version = 11 : i64} {
  func.func @_temporal_encoder_kernel(%arg0: i32, %arg1: memref<6x1xf32, #tpu.memory_space<vmem>>, %arg2: memref<6x1xf32, #tpu.memory_space<vmem>>, %arg3: memref<1x8xf32, #tpu.memory_space<vmem>>, %arg4: memref<1x8xf32, #tpu.memory_space<vmem>>, %arg5: memref<1xf32, #tpu.memory_space<smem>>, %arg6: memref<6x128xf32, #tpu.memory_space<vmem>>, %arg7: memref<6x32xf32, #tpu.memory_space<vmem>>) attributes {dimension_semantics = [#tpu.dimension_semantics<parallel>], iteration_bounds = array<i64: 1>, scalar_prefetch = 0 : i64, scratch_operands = 1 : i64, tpu.core_type = #tpu.core_type<tc>, window_params = [{transform_indices = @transform_0, window_bounds = array<i64: 6, 1>}, {transform_indices = @transform_1, window_bounds = array<i64: 6, 1>}, {pipeline_mode = #tpu.pipeline_mode<synchronous>, transform_indices = @transform_2, window_bounds = array<i64: 1, 8>}, {pipeline_mode = #tpu.pipeline_mode<synchronous>, transform_indices = @transform_3, window_bounds = array<i64: 1, 8>}, {transform_indices = @transform_4, window_bounds = array<i64: 1>}, {transform_indices = @transform_5, window_bounds = array<i64: 6, 128>}]} {
    %c0 = arith.constant 0 : index
    %0 = memref.load %arg5[%c0] : memref<1xf32, #tpu.memory_space<smem>>
    %c0_0 = arith.constant 0 : index
    %c0_1 = arith.constant 0 : index
    %1 = vector.load %arg1[%c0_0, %c0_1] : memref<6x1xf32, #tpu.memory_space<vmem>>, vector<6x1xf32>
    %c0_2 = arith.constant 0 : index
    %c0_3 = arith.constant 0 : index
    %2 = vector.load %arg3[%c0_2, %c0_3] : memref<1x8xf32, #tpu.memory_space<vmem>>, vector<1x8xf32>
    %3 = vector.broadcast %1 : vector<6x1xf32> to vector<6x8xf32>
    %4 = vector.broadcast %2 : vector<1x8xf32> to vector<6x8xf32>
    %5 = arith.mulf %3, %4 : vector<6x8xf32>
    %c0_4 = arith.constant 0 : index
    %c0_5 = arith.constant 0 : index
    %6 = vector.load %arg2[%c0_4, %c0_5] : memref<6x1xf32, #tpu.memory_space<vmem>>, vector<6x1xf32>
    %c0_6 = arith.constant 0 : index
    %c0_7 = arith.constant 0 : index
    %7 = vector.load %arg4[%c0_6, %c0_7] : memref<1x8xf32, #tpu.memory_space<vmem>>, vector<1x8xf32>
    %8 = vector.broadcast %6 : vector<6x1xf32> to vector<6x8xf32>
    %9 = vector.broadcast %7 : vector<1x8xf32> to vector<6x8xf32>
    %10 = arith.mulf %8, %9 : vector<6x8xf32>
    %11 = math.sin %5 : vector<6x8xf32>
    %12 = vector.broadcast %0 : f32 to vector<6x8xf32>
    %13 = arith.mulf %12, %11 : vector<6x8xf32>
    %14 = math.cos %5 : vector<6x8xf32>
    %15 = vector.broadcast %0 : f32 to vector<6x8xf32>
    %16 = arith.mulf %15, %14 : vector<6x8xf32>
    %17 = math.sin %10 : vector<6x8xf32>
    %18 = vector.broadcast %0 : f32 to vector<6x8xf32>
    %19 = arith.mulf %18, %17 : vector<6x8xf32>
    %20 = math.cos %10 : vector<6x8xf32>
    %21 = vector.broadcast %0 : f32 to vector<6x8xf32>
    %22 = arith.mulf %21, %20 : vector<6x8xf32>
    %c0_8 = arith.constant 0 : index
    %c0_9 = arith.constant 0 : index
    %23 = vector.load %arg7[%c0_8, %c0_9] : memref<6x32xf32, #tpu.memory_space<vmem>>, vector<6x8xf32>
    tpu.vector_store %arg7[%c0_8, %c0_9], %13 {strides = array<i32>} : memref<6x32xf32, #tpu.memory_space<vmem>>, vector<6x8xf32>,
    %c0_10 = arith.constant 0 : index
    %c8 = arith.constant 8 : index
    %24 = vector.load %arg7[%c0_10, %c8] : memref<6x32xf32, #tpu.memory_space<vmem>>, vector<6x8xf32>
    tpu.vector_store %arg7[%c0_10, %c8], %16 {strides = array<i32>} : memref<6x32xf32, #tpu.memory_space<vmem>>, vector<6x8xf32>,
    %c0_11 = arith.constant 0 : index
    %c16 = arith.constant 16 : index
    %25 = vector.load %arg7[%c0_11, %c16] : memref<6x32xf32, #tpu.memory_space<vmem>>, vector<6x8xf32>
    tpu.vector_store %arg7[%c0_11, %c16], %19 {strides = array<i32>} : memref<6x32xf32, #tpu.memory_space<vmem>>, vector<6x8xf32>,
    %c0_12 = arith.constant 0 : index
    %c24 = arith.constant 24 : index
    %26 = vector.load %arg7[%c0_12, %c24] : memref<6x32xf32, #tpu.memory_space<vmem>>, vector<6x8xf32>
    tpu.vector_store %arg7[%c0_12, %c24], %22 {strides = array<i32>} : memref<6x32xf32, #tpu.memory_space<vmem>>, vector<6x8xf32>,
    %c0_13 = arith.constant 0 : index
    %c0_14 = arith.constant 0 : index
    %27 = vector.load %arg7[%c0_13, %c0_14] : memref<6x32xf32, #tpu.memory_space<vmem>>, vector<6x32xf32>
    %c0_15 = arith.constant 0 : index
    %c0_16 = arith.constant 0 : index
    %28 = vector.load %arg6[%c0_15, %c0_16] : memref<6x128xf32, #tpu.memory_space<vmem>>, vector<6x32xf32>
    tpu.vector_store %arg6[%c0_15, %c0_16], %27 {strides = array<i32>} : memref<6x128xf32, #tpu.memory_space<vmem>>, vector<6x32xf32>,
    %c0_17 = arith.constant 0 : index
    %c32 = arith.constant 32 : index
    %29 = vector.load %arg6[%c0_17, %c32] : memref<6x128xf32, #tpu.memory_space<vmem>>, vector<6x32xf32>
    tpu.vector_store %arg6[%c0_17, %c32], %27 {strides = array<i32>} : memref<6x128xf32, #tpu.memory_space<vmem>>, vector<6x32xf32>,
    %c0_18 = arith.constant 0 : index
    %c64 = arith.constant 64 : index
    %30 = vector.load %arg6[%c0_18, %c64] : memref<6x128xf32, #tpu.memory_space<vmem>>, vector<6x32xf32>
    tpu.vector_store %arg6[%c0_18, %c64], %27 {strides = array<i32>} : memref<6x128xf32, #tpu.memory_space<vmem>>, vector<6x32xf32>,
    %c0_19 = arith.constant 0 : index
    %c96 = arith.constant 96 : index
    %31 = vector.load %arg6[%c0_19, %c96] : memref<6x128xf32, #tpu.memory_space<vmem>>, vector<6x32xf32>
    tpu.vector_store %arg6[%c0_19, %c96], %27 {strides = array<i32>} : memref<6x128xf32, #tpu.memory_space<vmem>>, vector<6x32xf32>,
    return
  }
  func.func @transform_0(%arg0: i32) -> (i32, i32) {
    %c0_i32 = arith.constant 0 : i32
    %c0_i32_0 = arith.constant 0 : i32
    return %arg0, %c0_i32 : i32, i32
  }
  func.func @transform_1(%arg0: i32) -> (i32, i32) {
    %c0_i32 = arith.constant 0 : i32
    %c0_i32_0 = arith.constant 0 : i32
    return %arg0, %c0_i32 : i32, i32
  }
  func.func @transform_2(%arg0: i32) -> (i32, i32) {
    %c0_i32 = arith.constant 0 : i32
    %c0_i32_0 = arith.constant 0 : i32
    %c0_i32_1 = arith.constant 0 : i32
    return %c0_i32, %c0_i32_0 : i32, i32
  }
  func.func @transform_3(%arg0: i32) -> (i32, i32) {
    %c0_i32 = arith.constant 0 : i32
    %c0_i32_0 = arith.constant 0 : i32
    %c0_i32_1 = arith.constant 0 : i32
    return %c0_i32, %c0_i32_0 : i32, i32
  }
  func.func @transform_4(%arg0: i32) -> i32 {
    %c0_i32 = arith.constant 0 : i32
    %c0_i32_0 = arith.constant 0 : i32
    return %c0_i32 : i32
  }
  func.func @transform_5(%arg0: i32) -> (i32, i32) {
    %c0_i32 = arith.constant 0 : i32
    %c0_i32_0 = arith.constant 0 : i32
    return %arg0, %c0_i32 : i32, i32
  }
}

</mosaic_0001>

<bundles_post_ra>
// kernel: tpu_custom_call.1
= control target key start
LH: loop header
LB: loop body
LE: loop exit
PB: predicated region body
PF: predicated region fallthrough
CT: control target
= control target key end

     0   :  { %v596_v1 = vmov 0   ;;  %s727_s0 = inlined_call_operand.vmem [shape: f32[6,1], index: 0, kind: input, shape index: {}]   ;;  %s728_s1 = inlined_call_operand.vmem [shape: f32[6,1], index: 1, kind: input, shape index: {}]   ;;  %s729_s2 = inlined_call_operand.vmem [shape: f32[1,8], index: 2, kind: input, shape index: {}]   ;;  %s730_s3 = inlined_call_operand.vmem [shape: f32[1,8], index: 3, kind: input, shape index: {}]   ;;  %s731_s4 = inlined_call_operand.<no memory space> [shape: f32[1], index: 4, kind: input, shape index: {}]   ;;  %s732_s5 = inlined_call_operand.hbm [shape: f32[6,128], index: 5, kind: output, shape index: {}]  }
   0x1   :  { %v23_v0 = vld [vmem:[%s727_s0] sm:$0x3f]  ;;  %563 = vset.pattern.permute.xlu0 %v596_v1 }
   0x2   :  { %27 = vperm.xlu0 %563, %v23_v0   ;;  %v37_v2 = vld [vmem:[%s728_s1] sm:$0x3f] }
   0x3   :  { %11 = vsyncpa [#allocation5], 0  ;;  %v523_v3 = vld [vmem:[%s729_s2] ss:$0 sm:$0xff]  ;;  %v597_v25 = vmov 683565275  }
   0x4   :  { %v524_v6 = vld [vmem:[%s730_s3] ss:$0 sm:$0xff]  ;;  %v598_v29 = vmov 2475754826   ;;  %v599_v31 = vmov 2131351028  }
   0x5   :  { %v600_v33 = vmov 2102212464   ;;  %v601_v35 = vmov 920167782   ;;  %v602_v42 = vmov 1326507024  }
   0x6   :  { %41 = vperm.xlu0 %563, %v37_v2   ;;  %s603_s2 = smov 8   ;;  %s604_s3 = smov 24  }
   0x7   :  { %s606_s26 = smov 64   ;;  %s607_s27 = smov 32  }
   0x8   :  { %s608_s28 = smov 96   ;;  %s609_s29 = smov [#allocation4]  }
   0x9   :  { %s515_s30 = sshll.u32 %s609_s29, 4  ;;  %s516_s30 = int_to_ptr.vmem [resolvable:$true] %s515_s30 }
   0xa   :  { %s572_s6 = scalar_lea.vmem %s516_s30, 128  ;;  %p577_p1 = scmp.lt.s32.totalorder %s516_s30, %s516_s30 }
   0xb   :  { %p573_p0 = scmp.ne.s32.totalorder %s516_s30, %s572_s6  ;;  %p578_p2 = scmp.lt.s32.totalorder %s572_s6, %s572_s6 }
   0xd   :  { %p579_p3 = por %p578_p2, %p577_p1 }
   0xf   :  { %p580_p4 = pnand %p579_p3, %p573_p0 }
  0x81   :  { %v28_v4 = vpop.permute.xlu0 %27 }
  0x82   :  { %v649_v5 = vmul.f32 %v523_v3, %v28_v4 }
  0x84   :  { %v51_v7 = vand.u32 2147483647, %v649_v5  ;;  %v54_v8 = vand.u32 2139095040, %v649_v5  ;;  %vm53_vm14 = vcmp.lt.s32.totalorder %v649_v5, 0 }
  0x85   :  { %v42_v9 = vpop.permute.xlu0 %41 }
  0x86   :  { %v55_v10 = vshrl.u32 %v54_v8, 23  ;;  %v656_v11 = vmul.f32 %v524_v6, %v42_v9  ;;  %v58_v12 = vand.u32 8388607, %v51_v7  ;;  %vm52_vm15 = vcmp.le.f32.partialorder %v51_v7, 0.7853982 }
  0x88   :  { %v525_v13 = vadd.s32 4294967169, %v55_v10  ;;  %v264_v14 = vand.u32 2139095040, %v656_v11  ;;  %v59_v16 = vor.u32 8388608, %v58_v12  ;;  %v261_v18 = vand.u32 2147483647, %v656_v11 }
  0x8a   :  { %v61_v15 = vadd.s32 1, %v525_v13  ;;  %v265_v17 = vshrl.u32 %v264_v14, 23  ;;  %v662_v23 = vshll.u32 %v59_v16, 8  ;;  %v268_v27 = vand.u32 8388607, %v261_v18 }
  0x8c   :  { %vm62_vm0 = vcmp.gt.s32.totalorder %v61_v15, 0  ;;  %v533_v20 = vadd.s32 4294967169, %v265_v17  ;;  %v269_v57 = vor.u32 8388608, %v268_v27 }
  0x8d   :  { %v63_v19 = vsel %vm62_vm0, %v61_v15, 0  ;;  %vm263_vm0 = vcmp.lt.s32.totalorder %v656_v11, 0 }
  0x8e   :  { %v64_v21 = vshrl.u32 %v63_v19, 5  ;;  %v65_v22 = vand.u32 31, %v63_v19  ;;  %v271_v28 = vadd.s32 1, %v533_v20  ;;  %v309_v8 = vshll.u32 %v269_v57, 8 }
  0x90   :  { %v66_v24 = vsub.s32 32, %v65_v22  ;;  %v68_v26 = vshll.u32 %v597_v25, %v65_v22  ;;  %v71_v30 = vshll.u32 %v598_v29, %v65_v22  ;;  %v74_v32 = vshll.u32 %v599_v31, %v65_v22 }
  0x91   :  { %v77_v34 = vshll.u32 %v600_v33, %v65_v22  ;;  %v80_v36 = vshll.u32 %v601_v35, %v65_v22  ;;  %vm83_vm1 = vcmp.lt.s32.totalorder %v64_v21, 1  ;;  %vm85_vm2 = vcmp.lt.s32.totalorder %v64_v21, 3 }
  0x92   :  { %v69_v37 = vshrl.u32 %v598_v29, %v66_v24  ;;  %v72_v38 = vshrl.u32 %v599_v31, %v66_v24  ;;  %v75_v39 = vshrl.u32 %v600_v33, %v66_v24  ;;  %v67_v40 = vshrl.u32 %v597_v25, %v66_v24 }
  0x93   :  { %v78_v41 = vshrl.u32 %v601_v35, %v66_v24  ;;  %v81_v43 = vshrl.u32 %v602_v42, %v66_v24  ;;  %vm272_vm3 = vcmp.gt.s32.totalorder %v271_v28, 0  ;;  %vm86_vm4 = vcmp.lt.s32.totalorder %v64_v21, 4 }
  0x94   :  { %v70_v44 = vor.u32 %v69_v37, %v68_v26  ;;  %v73_v45 = vor.u32 %v72_v38, %v71_v30  ;;  %v76_v46 = vor.u32 %v75_v39, %v74_v32  ;;  %v273_v49 = vsel %vm272_vm3, %v271_v28, 0 }
  0x95   :  { %v79_v47 = vor.u32 %v78_v41, %v77_v34  ;;  %v82_v48 = vor.u32 %v81_v43, %v80_v36  ;;  %vm84_vm5 = vcmp.lt.s32.totalorder %v64_v21, 2  ;;  %v275_v60 = vand.u32 31, %v273_v49 }
  0x96   :  { %v87_v50 = vsel %vm83_vm1, %v67_v40, %v70_v44  ;;  %v88_v51 = vsel %vm86_vm4, %v76_v46, 2102212464  ;;  %v91_v52 = vsel %vm83_vm1, %v70_v44, %v73_v45  ;;  %v95_v53 = vsel %vm83_vm1, %v73_v45, %v76_v46 }
  0x97   :  { %v89_v54 = vsel %vm85_vm2, %v73_v45, %v88_v51  ;;  %v92_v55 = vsel %vm86_vm4, %v79_v47, 920167782  ;;  %v96_v56 = vsel %vm86_vm4, %v82_v48, 1326507024  ;;  %v274_v4 = vshrl.u32 %v273_v49, 5 }
  0x98   :  { %v93_v58 = vsel %vm85_vm2, %v76_v46, %v92_v55  ;;  %v97_v59 = vsel %vm85_vm2, %v79_v47, %v96_v56  ;;  %v90_v61 = vsel %vm84_vm5, %v87_v50, %v89_v54  ;;  %v276_v6 = vsub.s32 32, %v275_v60 }
  0x99   :  { %v94_v62 = vsel %vm84_vm5, %v91_v52, %v93_v58  ;;  %v98_v63 = vsel %vm84_vm5, %v95_v53, %v97_v59  ;;  %v106_v9 = vmul.u32 %v662_v23, %v90_v61  ;;  %v278_v10 = vshll.u32 %v597_v25, %v275_v60 }
  0x9a   :  { %v675_v0 = vmul.u32.u64.low %v662_v23, %v98_v63  ;;  %v676_v1 = vmul.u32.u64.high %v662_v23, %v98_v63, %v675_v0  ;;  %v679_v2 = vmul.u32.u64.low %v662_v23, %v94_v62  ;;  %v680_v3 = vmul.u32.u64.high %v662_v23, %v94_v62, %v679_v2 }
  0x9b   :  { %v281_v12 = vshll.u32 %v598_v29, %v275_v60  ;;  %v284_v13 = vshll.u32 %v599_v31, %v275_v60  ;;  %v279_v14 = vshrl.u32 %v598_v29, %v276_v6  ;;  %v282_v15 = vshrl.u32 %v599_v31, %v276_v6 }
  0x9c   :  { %v285_v16 = vshrl.u32 %v600_v33, %v276_v6  ;;  %v287_v17 = vshll.u32 %v600_v33, %v275_v60  ;;  %vm108_vm6 = vc.u32 %v676_v1, %v679_v2  ;;  %v109_v19 = vadd.s32 1, %v680_v3 }
  0x9d   :  { %v288_v20 = vshrl.u32 %v601_v35, %v276_v6  ;;  %v290_v21 = vshll.u32 %v601_v35, %v275_v60  ;;  %v280_v22 = vor.u32 %v279_v14, %v278_v10  ;;  %v283_v24 = vor.u32 %v282_v15, %v281_v12 }
  0x9e   :  { %v286_v26 = vor.u32 %v285_v16, %v284_v13  ;;  %v291_v27 = vshrl.u32 %v602_v42, %v276_v6  ;;  %v110_v23 = vsel %vm108_vm6, %v109_v19, %v680_v3  ;;  %vm293_vm7 = vcmp.lt.s32.totalorder %v274_v4, 1 }
  0x9f   :  { %v289_v28 = vor.u32 %v288_v20, %v287_v17  ;;  %vm296_vm8 = vcmp.lt.s32.totalorder %v274_v4, 4  ;;  %v111_v29 = vadd.s32 %v110_v23, %v106_v9  ;;  %vm295_vm9 = vcmp.lt.s32.totalorder %v274_v4, 3 }
  0xa0   :  { %v292_v30 = vor.u32 %v291_v27, %v290_v21  ;;  %v298_v31 = vsel %vm296_vm8, %v286_v26, 2102212464  ;;  %v277_v32 = vshrl.u32 %v597_v25, %v276_v6  ;;  %v301_v33 = vsel %vm293_vm7, %v280_v22, %v283_v24 }
  0xa1   :  { %v302_v34 = vsel %vm296_vm8, %v289_v28, 920167782  ;;  %v305_v36 = vsel %vm293_vm7, %v283_v24, %v286_v26  ;;  %v112_v37 = vadd.s32 536870912, %v111_v29  ;;  %vm294_vm10 = vcmp.lt.s32.totalorder %v274_v4, 2 }
  0xa2   :  { %v303_v35 = vsel %vm295_vm9, %v286_v26, %v302_v34  ;;  %v306_v38 = vsel %vm296_vm8, %v292_v30, 1326507024  ;;  %v297_v39 = vsel %vm293_vm7, %v277_v32, %v280_v22  ;;  %v299_v40 = vsel %vm295_vm9, %v283_v24, %v298_v31 }
  0xa3   :  { %v304_v41 = vsel %vm294_vm10, %v301_v33, %v303_v35  ;;  %v307_v42 = vsel %vm295_vm9, %v289_v28, %v306_v38  ;;  %v113_v43 = vshrl.u32 %v112_v37, 30  ;;  %v300_v49 = vsel %vm294_vm10, %v297_v39, %v299_v40 }
  0xa4   :  { %v308_v44 = vsel %vm294_vm10, %v305_v36, %v307_v42  ;;  %v690_v45 = vmul.u32.u64.low %v309_v8, %v304_v41  ;;  %v691_v46 = vmul.u32.u64.high %v309_v8, %v304_v41, %v690_v45  ;;  %v316_v52 = vmul.u32 %v309_v8, %v300_v49 }
  0xa5   :  { %v693_v47 = vmul.u32.u64.low %v309_v8, %v308_v44  ;;  %v694_v48 = vmul.u32.u64.high %v309_v8, %v308_v44, %v693_v47  ;;  %v114_v25 = vshll.u32 %v113_v43, 30  ;;  %v107_v0 = vadd.s32 %v679_v2, %v676_v1 }
  0xa6   :  { %v319_v51 = vadd.s32 1, %v691_v46  ;;  %v137_v24 = vsub.s32 4, %v113_v43  ;;  %vm262_vm1 = vcmp.le.f32.partialorder %v261_v18, 0.7853982  ;;  %v155_v49 = vstv %s731_s4  ;;  %s605_s4 = smov 16  }
  0xa7   :  { %v115_v50 = vsub.s32 %v111_v29, %v114_v25  ;;  %vm318_vm11 = vc.u32 %v694_v48, %v690_v45  ;;  %v317_v1 = vadd.s32 %v690_v45, %v694_v48  ;;  %vm143_vm8 = vweird.f32 %v649_v5 }
  0xa8   :  { %v320_v54 = vsel %vm318_vm11, %v319_v51, %v691_v46  ;;  %v138_v31 = vsel %vm53_vm14, %v137_v24, %v113_v43  ;;  %vm470_vm9 = vcmask 62464  }
  0xa9   :  { %v117_v53 = vsub.s32 0, %v115_v50  ;;  %v321_v55 = vadd.s32 %v320_v54, %v316_v52  ;;  %v140_v37 = vsel %vm52_vm15, 0, %v138_v31 }
  0xaa   :  { %v144_v39 = vadd.s32 3, %v140_v37  ;;  %v250_v44 = vand.u32 3, %v140_v37 }
  0xab   :  { %v526_v56 = vmin.u32 %v117_v53, %v115_v50  ;;  %v322_v57 = vadd.s32 536870912, %v321_v55 }
  0xac   :  { %v145_v45 = vand.u32 3, %v144_v39  ;;  %vm255_vm2 = vcmp.eq.s32.totalorder %v250_v44, 2  ;;  %vm252_vm5 = vcmp.eq.s32.totalorder %v250_v44, 0  ;;  %vm251_vm7 = vcmp.lt.s32.totalorder %v250_v44, 2 }
  0xad   :  { %v119_v58 = vclz %v526_v56  ;;  %v323_v59 = vshrl.u32 %v322_v57, 30 }
  0xae   :  { %vm150_vm3 = vcmp.eq.s32.totalorder %v145_v45, 2  ;;  %vm147_vm4 = vcmp.eq.s32.totalorder %v145_v45, 0  ;;  %vm146_vm6 = vcmp.lt.s32.totalorder %v145_v45, 2 }
  0xaf   :  { %v527_v60 = vadd.s32 4294967294, %v119_v58  ;;  %v324_v61 = vshll.u32 %v323_v59, 30  ;;  %v347_v41 = vsub.s32 4, %v323_v59 }
  0xb1   :  { %vm528_vm12 = vcmp.lt.s32.totalorder %v527_v60, 0  ;;  %v325_v63 = vsub.s32 %v321_v55, %v324_v61  ;;  %v348_v43 = vsel %vm263_vm0, %v347_v41, %v323_v59 }
  0xb2   :  { %v122_v62 = vsel %vm528_vm12, 0, %v527_v60  ;;  %v350_v51 = vsel %vm262_vm1, 0, %v348_v43 }
  0xb3   :  { %v123_v3 = vsub.s32 32, %v122_v62  ;;  %v127_v4 = vsub.s32 4294967266, %v122_v62  ;;  %v327_v6 = vsub.s32 0, %v325_v63  ;;  %v124_v8 = vshll.u32 %v115_v50, %v122_v62 }
  0xb4   :  { %v354_v57 = vadd.s32 3, %v350_v51  ;;  %v459_v62 = vand.u32 3, %v350_v51 }
  0xb5   :  { %v125_v9 = vshrl.u32 %v107_v0, %v123_v3  ;;  %v128_v10 = vadd.s32 127, %v127_v4  ;;  %v534_v12 = vmin.u32 %v327_v6, %v325_v63 }
  0xb6   :  { %vm464_vm10 = vcmp.eq.s32.totalorder %v459_v62, 2  ;;  %vm461_vm12 = vcmp.eq.s32.totalorder %v459_v62, 0 }
  0xb7   :  { %v126_v13 = vor.u32 %v125_v9, %v124_v8  ;;  %v129_v14 = vshll.u32 %v128_v10, 23  ;;  %v329_v15 = vclz %v534_v12 }
  0xb9   :  { %v130_v16 = vor.u32 4788187, %v129_v14  ;;  %v535_v17 = vadd.s32 4294967294, %v329_v15  ;;  %v133_v20 = vcvt.s32.f32 %v126_v13 }
  0xbb   :  { %v131_v19 = vand.u32 2147483647, %v130_v16  ;;  %vm536_vm13 = vcmp.lt.s32.totalorder %v535_v17, 0 }
  0xbc   :  { %v332_v22 = vsel %vm536_vm13, 0, %v535_v17 }
  0xbd   :  { %v134_v21 = vmul.f32 %v133_v20, %v131_v19  ;;  %v333_v2 = vsub.s32 32, %v332_v22  ;;  %v337_v26 = vsub.s32 4294967266, %v332_v22  ;;  %v334_v23 = vshll.u32 %v325_v63, %v332_v22 }
  0xbe   :  { %v355_v63 = vand.u32 3, %v354_v57 }
  0xbf   :  { %v135_v27 = vxor.u32 2147483648, %v134_v21  ;;  %v335_v28 = vshrl.u32 %v317_v1, %v333_v2  ;;  %v338_v29 = vadd.s32 127, %v337_v26 }
  0xc0   :  { %vm360_vm11 = vcmp.eq.s32.totalorder %v355_v63, 2  ;;  %vm357_vm13 = vcmp.eq.s32.totalorder %v355_v63, 0 }
  0xc1   :  { %v136_v30 = vsel %vm53_vm14, %v135_v27, %v134_v21  ;;  %v336_v32 = vor.u32 %v335_v28, %v334_v23  ;;  %v339_v33 = vshll.u32 %v338_v29, 23  ;;  %vm460_vm14 = vcmp.lt.s32.totalorder %v459_v62, 2 }
  0xc2   :  { %v139_v34 = vsel %vm52_vm15, %v649_v5, %v136_v30  ;;  %vm356_vm15 = vcmp.lt.s32.totalorder %v355_v63, 2 }
  0xc3   :  { %564 = vcosq.f32 %v139_v34  ;;  %v340_v36 = vor.u32 4788187, %v339_v33  ;;  %v343_v38 = vcvt.s32.f32 %v336_v32 }
  0xc4   :  { %566 = vsinq.f32 %v139_v34 }
  0xc5   :  { %v341_v35 = vand.u32 2147483647, %v340_v36 }
  0xc7   :  { %v344_v40 = vmul.f32 %v343_v38, %v341_v35 }
  0xc9   :  { %v345_v42 = vxor.u32 2147483648, %v344_v40 }
  0xcb   :  { %v346_v7 = vsel %vm263_vm0, %v345_v42, %v344_v40  ;;  %vm353_vm0 = vweird.f32 %v656_v11 }
  0xcc   :  { %v349_v47 = vsel %vm262_vm1, %v656_v11, %v346_v7  ;;  %vm476_vm1 = vcmask 128064  }
  0xcd   :  { %v565_v46 = vpop.eup %564  ;;  %568 = vcosq.f32 %v349_v47 }
  0xce   :  { %v567_v48 = vpop.eup %566  ;;  %v151_v25 = vxor.u32 2147483648, %v565_v46  ;;  %570 = vsinq.f32 %v349_v47 }
  0xcf   :  { %v148_v50 = vxor.u32 2147483648, %v567_v48 }
  0xd0   :  { %v257_v18 = vsel %vm255_vm2, %v151_v25, %v567_v48  ;;  %v152_v52 = vsel %vm150_vm3, %v151_v25, %v567_v48  ;;  %vm482_vm2 = vcmask 193664   ;;  %vm488_vm3 = vcmask 259264  }
  0xd1   :  { %v254_v53 = vsel %vm252_vm5, %v565_v46, %v148_v50  ;;  %v149_v54 = vsel %vm147_vm4, %v565_v46, %v148_v50  ;;  %vm491_vm4 = vcmask 259072   ;;  %vm497_vm5 = vcmask 521472  }
  0xd2   :  { %v258_v55 = vsel %vm251_vm7, %v254_v53, %v257_v18  ;;  %v153_v56 = vsel %vm146_vm6, %v149_v54, %v152_v52  ;;  %vm502_vm6 = vcmask 783872   ;;  %vm507_vm7 = vcmask 1046272  }
  0xd3   :  { %v259_v58 = vsel %vm143_vm8, nan, %v258_v55  ;;  %v154_v59 = vsel %vm143_vm8, nan, %v153_v56 }
  0xd4   :  { %v260_v60 = vmul.f32 %v259_v58, %v155_v49  ;;  %v156_v61 = vmul.f32 %v155_v49, %v154_v59 }
  0xd6   :  { %473 = vrot.lane.b32.xlu1 %v260_v60, %s603_s2  ;;  %471 = vst.msk [vmem:[#allocation2] sm:$0x3f] %vm470_vm9, %v156_v61 }
  0xd7   :  { %v569_v0 = vpop.eup %568 }
  0xd8   :  { %v571_v3 = vpop.eup %570  ;;  %v361_v4 = vxor.u32 2147483648, %v569_v0 }
  0xd9   :  { %v358_v6 = vxor.u32 2147483648, %v571_v3 }
  0xda   :  { %v466_v5 = vsel %vm464_vm10, %v361_v4, %v571_v3  ;;  %v362_v8 = vsel %vm360_vm11, %v361_v4, %v571_v3 }
  0xdb   :  { %v463_v9 = vsel %vm461_vm12, %v569_v0, %v358_v6  ;;  %v359_v10 = vsel %vm357_vm13, %v569_v0, %v358_v6 }
  0xdc   :  { %v467_v12 = vsel %vm460_vm14, %v463_v9, %v466_v5  ;;  %v363_v13 = vsel %vm356_vm15, %v359_v10, %v362_v8 }
  0xdd   :  { %v468_v14 = vsel %vm353_vm0, nan, %v467_v12  ;;  %v364_v15 = vsel %vm353_vm0, nan, %v363_v13 }
  0xde   :  { %v469_v16 = vmul.f32 %v468_v14, %v155_v49  ;;  %v365_v17 = vmul.f32 %v364_v15, %v155_v49 }
  0xe0   :  { %485 = vrot.lane.b32.xlu0 %v469_v16, %s604_s3  ;;  %479 = vrot.lane.b32.xlu1 %v365_v17, %s605_s4 }
 0x148   :  { %v474_v19 = vpop.permute.xlu1 %473 }
 0x149   :  { %477 = vst.msk [vmem:[#allocation2] sm:$0x3f] %vm476_vm1, %v474_v19 }
 0x152   :  { %v486_v20 = vpop.permute.xlu0 %485  ;;  %v480_v21 = vpop.permute.xlu1 %479 }
 0x153   :  { %483 = vst.msk [vmem:[#allocation2] sm:$0x3f] %vm482_vm2, %v480_v21 }
 0x154   :  { %489 = vst.msk [vmem:[#allocation2] sm:$0x3f] %vm488_vm3, %v486_v20 }
 0x15b   :  { %v490_v11 = vld [vmem:[#allocation2] sm:$0x3f] }
 0x15c   :  { %499 = vrot.lane.b32.xlu0 %v490_v11, %s606_s26  ;;  %494 = vrot.lane.b32.xlu1 %v490_v11, %s607_s27  ;;  %492 = vst.msk [vmem:[#allocation4] sm:$0x3f] %vm491_vm4, %v490_v11 }
 0x160   :  { %504 = vrot.lane.b32.xlu1 %v490_v11, %s608_s28 }
 0x1ce   :  { %v500_v22 = vpop.permute.xlu0 %499  ;;  %v495_v24 = vpop.permute.xlu1 %494 }
 0x1cf   :  { %498 = vst.msk [vmem:[#allocation4] sm:$0x3f] %vm497_vm5, %v495_v24 }
 0x1d0   :  { %503 = vst.msk [vmem:[#allocation4] sm:$0x3f] %vm502_vm6, %v500_v22 }
 0x1d2   :  { %v505_v1 = vpop.permute.xlu1 %504 }
 0x1d3   :  { %508 = vst.msk [vmem:[#allocation4] sm:$0x3f] %vm507_vm7, %v505_v1 }
 0x1d4   :  { %583 = shalt.err (!%p580_p4)
}
 0x1d5   :  { %s584_s9 = scalar_lea.hbm %s732_s5, 128 }
 0x1d6   :  { %p585_p5 = scmp.ne.s32.totalorder %s732_s5, %s584_s9  ;;  %p588_p6 = scmp.lt.u32.totalorder %s584_s9, %s732_s5 }
 0x1d8   :  { %p590_p7 = pnand %p588_p6, %p585_p5 }
 0x1da   :  { %593 = shalt.err (!%p590_p7)
}
 0x1db   :  { %518 = dma.vmem_to_hbm [thread:$0]  %s516_s30, 128, %s732_s5, [#allocation5]  }
 0x1dc   :  { %594 = dma.done.wait [#allocation5], 128  }
 0x1dd   :  { %595 = vsyncadd [#allocation5], 4294967168 }
 0x1de   :  { %522 = vsyncpa [#allocation5], 1 }

</bundles_post_ra>
